<compile_context>
chip_gen: v7x
topology: tpu7x:2x2x1
jax: 0.10.0
libtpu: 0.0.40
codegen_flags: <defaults>
</compile_context>

<pallas_src>
import functools
import math

import jax
import jax.numpy as jnp
from jax.experimental import pallas as pl
from jax.experimental.pallas import tpu as pltpu


HIDDEN = 256  # Mlp(hidden_sizes=[256, 256], output_size=1)


def _critic_kernel(state_ref, action_ref, w1_ref, b1_ref, w2_ref, b2_ref,
                   w3t_ref, b3_ref, out_ref, *, n_nets, state_dim):
    s = state_ref[...]                                   # (Bt, S)
    a = action_ref[...]                                  # (Bt, A)

    n_cols = out_ref.shape[-1]                           # == n_nets
    col = jax.lax.broadcasted_iota(jnp.int32, (1, n_cols), 1)
    q_all = jnp.zeros(out_ref.shape, jnp.float32)        # (Bt, n_nets)

    # Static unroll over the (small) number of critic nets: one fused step,
    # full LLO scheduling visibility, no per-net grid overhead.
    for n in range(n_nets):
        w1n = w1_ref[n]                                  # (D, H)
        # Layer 1: the cat([state, action]) is fused by splitting W1's rows.
        h = (jnp.dot(s, w1n[:state_dim], preferred_element_type=jnp.float32)
             + jnp.dot(a, w1n[state_dim:], preferred_element_type=jnp.float32)
             + b1_ref[n])                                # (Bt, H)
        h = jnp.maximum(h, 0.0)

        # Layer 2: H x H MXU matmul.
        h = jnp.dot(h, w2_ref[n], preferred_element_type=jnp.float32) + b2_ref[n]
        h = jnp.maximum(h, 0.0)                          # (Bt, H)

        # Layer 3 (H -> 1): VPU multiply + lane reduction instead of an N=1
        # MXU matmul (avoids a lane-sparse MXU result tile).
        q_n = jnp.sum(h * w3t_ref[n], axis=-1, keepdims=True)   # (Bt, 1)

        # Place q_n into output column n (pure VPU select, no concat / masked
        # per-column stores).
        q_all = jnp.where(col == n, q_n, q_all)

    out_ref[...] = (q_all + b3_ref[...]).astype(out_ref.dtype)


def critic_forward(state, action, params, *, block_b=512):
    """Pallas implementation of Critic.forward.

    state : (B, state_dim), action : (B, action_dim)
    returns quantiles : (B, n_nets, 1)   (matches torch.stack(..., dim=1))
    """
    w1, b1, w2, b2, w3t, b3 = params
    B, S = state.shape
    A = action.shape[1]
    n_nets, D, H = w1.shape

    tb = min(B, block_b)                                 # B-tile (single step for small B)
    grid = (pl.cdiv(B, tb),)

    kernel = functools.partial(_critic_kernel, n_nets=n_nets, state_dim=S)

    out = pl.pallas_call(
        kernel,
        out_shape=jax.ShapeDtypeStruct((B, n_nets), jnp.float32),
        grid_spec=pltpu.PrefetchScalarGridSpec(
            num_scalar_prefetch=0,
            grid=grid,
            in_specs=[
                pl.BlockSpec((tb, S), lambda i: (i, 0)),          # state
                pl.BlockSpec((tb, A), lambda i: (i, 0)),          # action
                pl.BlockSpec((n_nets, D, H), lambda i: (0, 0, 0)),  # W1 (all nets)
                pl.BlockSpec((n_nets, 1, H), lambda i: (0, 0, 0)),  # b1
                pl.BlockSpec((n_nets, H, H), lambda i: (0, 0, 0)),  # W2
                pl.BlockSpec((n_nets, 1, H), lambda i: (0, 0, 0)),  # b2
                pl.BlockSpec((n_nets, 1, H), lambda i: (0, 0, 0)),  # W3^T
                pl.BlockSpec((1, n_nets), lambda i: (0, 0)),        # b3
            ],
            out_specs=pl.BlockSpec((tb, n_nets), lambda i: (i, 0)),
        ),
        compiler_params=pltpu.CompilerParams(
            dimension_semantics=("parallel",)),
    )(state, action, w1, b1, w2, b2, w3t, b3)

    # (B, n_nets) -> (B, n_nets, 1): trailing unit dim only (no transpose).
    return out[:, :, None]


def init_critic_params(key, state_dim, action_dim, n_nets, hidden=HIDDEN):
    """Deterministic init matching torch.nn.Linear default U[-1/sqrt(fan_in), ...]."""
    D = state_dim + action_dim

    def linear(key, fan_in, shape):
        bound = 1.0 / math.sqrt(fan_in)
        return jax.random.uniform(key, shape, jnp.float32, -bound, bound)

    keys = jax.random.split(key, 6)
    w1 = linear(keys[0], D, (n_nets, D, hidden))
    b1 = linear(keys[1], D, (n_nets, 1, hidden))
    w2 = linear(keys[2], hidden, (n_nets, hidden, hidden))
    b2 = linear(keys[3], hidden, (n_nets, hidden, hidden))[:, :1, :]  # (n_nets,1,H)
    b2 = linear(keys[3], hidden, (n_nets, 1, hidden))
    w3t = linear(keys[4], hidden, (n_nets, 1, hidden))   # torch last_fc.weight layout
    b3 = linear(keys[5], hidden, (1, n_nets))
    return (w1, b1, w2, b2, w3t, b3)


def critic_reference(state, action, params):
    """Pure-JAX reference mirroring the PyTorch module."""
    w1, b1, w2, b2, w3t, b3 = params
    sa = jnp.concatenate([state, action], axis=1)
    outs = []
    for n in range(w1.shape[0]):
        h = jnp.maximum(sa @ w1[n] + b1[n, 0], 0.0)
        h = jnp.maximum(h @ w2[n] + b2[n, 0], 0.0)
        outs.append(h @ w3t[n].T + b3[0, n])             # (B, 1)
    return jnp.stack(outs, axis=1)                       # (B, n_nets, 1)


if __name__ == "__main__":
    B, state_dim, action_dim, n_nets = 2, 16, 8, 3

    key = jax.random.PRNGKey(0)
    k_s, k_a, k_p = jax.random.split(key, 3)
    state = jax.random.normal(k_s, (B, state_dim), jnp.float32)
    action = jax.random.normal(k_a, (B, action_dim), jnp.float32)
    params = init_critic_params(k_p, state_dim, action_dim, n_nets)

    quantiles = jax.block_until_ready(critic_forward(state, action, params))
    assert quantiles.shape == (B, n_nets, 1), quantiles.shape

    ref = critic_reference(state, action, params)
    assert jnp.allclose(quantiles, ref, atol=1e-5, rtol=1e-5), (
        float(jnp.max(jnp.abs(quantiles - ref))))

    print("KERNEL_OK")
</pallas_src>

<mosaic_0001>
module attributes {stable_mosaic.version = 11 : i64} {
  func.func @_critic_kernel(%arg0: i32, %arg1: memref<2x16xf32, #tpu.memory_space<vmem>>, %arg2: memref<2x8xf32, #tpu.memory_space<vmem>>, %arg3: memref<3x24x256xf32, #tpu.memory_space<vmem>>, %arg4: memref<3x1x256xf32, #tpu.memory_space<vmem>>, %arg5: memref<3x256x256xf32, #tpu.memory_space<vmem>>, %arg6: memref<3x1x256xf32, #tpu.memory_space<vmem>>, %arg7: memref<3x1x256xf32, #tpu.memory_space<vmem>>, %arg8: memref<1x3xf32, #tpu.memory_space<vmem>>, %arg9: memref<2x3xf32, #tpu.memory_space<vmem>>) attributes {dimension_semantics = [#tpu.dimension_semantics<parallel>], iteration_bounds = array<i64: 1>, scalar_prefetch = 0 : i64, scratch_operands = 0 : i64, tpu.core_type = #tpu.core_type<tc>, window_params = [{transform_indices = @transform_0, window_bounds = array<i64: 2, 16>}, {transform_indices = @transform_1, window_bounds = array<i64: 2, 8>}, {pipeline_mode = #tpu.pipeline_mode<synchronous>, transform_indices = @transform_2, window_bounds = array<i64: 3, 24, 256>}, {pipeline_mode = #tpu.pipeline_mode<synchronous>, transform_indices = @transform_3, window_bounds = array<i64: 3, 1, 256>}, {pipeline_mode = #tpu.pipeline_mode<synchronous>, transform_indices = @transform_4, window_bounds = array<i64: 3, 256, 256>}, {pipeline_mode = #tpu.pipeline_mode<synchronous>, transform_indices = @transform_5, window_bounds = array<i64: 3, 1, 256>}, {pipeline_mode = #tpu.pipeline_mode<synchronous>, transform_indices = @transform_6, window_bounds = array<i64: 3, 1, 256>}, {pipeline_mode = #tpu.pipeline_mode<synchronous>, transform_indices = @transform_7, window_bounds = array<i64: 1, 3>}, {transform_indices = @transform_8, window_bounds = array<i64: 2, 3>}]} {
    %c0 = arith.constant 0 : index
    %c0_0 = arith.constant 0 : index
    %0 = vector.load %arg1[%c0, %c0_0] : memref<2x16xf32, #tpu.memory_space<vmem>>, vector<2x16xf32>
    %c0_1 = arith.constant 0 : index
    %c0_2 = arith.constant 0 : index
    %1 = vector.load %arg2[%c0_1, %c0_2] : memref<2x8xf32, #tpu.memory_space<vmem>>, vector<2x8xf32>
    %2 = tpu.iota {dimensions = array<i32: 1>} : vector<1x3xi32>
    %cst = arith.constant 0.000000e+00 : f32
    %3 = vector.broadcast %cst : f32 to vector<2x3xf32>
    %c0_3 = arith.constant 0 : index
    %c0_4 = arith.constant 0 : index
    %c0_5 = arith.constant 0 : index
    %4 = vector.load %arg3[%c0_3, %c0_4, %c0_5] : memref<3x24x256xf32, #tpu.memory_space<vmem>>, vector<1x24x256xf32>
    %5 = vector.shape_cast %4 : vector<1x24x256xf32> to vector<24x256xf32>
    %6 = vector.extract_strided_slice %5 {offsets = [0, 0], sizes = [16, 256], strides = [1, 1]} : vector<24x256xf32> to vector<16x256xf32>
    %cst_6 = arith.constant dense<0.000000e+00> : vector<2x256xf32>
    %7 = tpu.matmul %0, %6, %cst_6 {dimension_numbers = #tpu.dot_dimension_numbers<[1], [0], [0], [1], [0, 0, 1, 1], [], []>} : vector<2x16xf32>, vector<16x256xf32>, vector<2x256xf32> -> vector<2x256xf32>
    %8 = vector.extract_strided_slice %5 {offsets = [16, 0], sizes = [8, 256], strides = [1, 1]} : vector<24x256xf32> to vector<8x256xf32>
    %cst_7 = arith.constant dense<0.000000e+00> : vector<2x256xf32>
    %9 = tpu.matmul %1, %8, %cst_7 {dimension_numbers = #tpu.dot_dimension_numbers<[1], [0], [0], [1], [0, 0, 1, 1], [], []>} : vector<2x8xf32>, vector<8x256xf32>, vector<2x256xf32> -> vector<2x256xf32>
    %10 = arith.addf %7, %9 : vector<2x256xf32>
    %c0_8 = arith.constant 0 : index
    %c0_9 = arith.constant 0 : index
    %c0_10 = arith.constant 0 : index
    %11 = vector.load %arg4[%c0_8, %c0_9, %c0_10] : memref<3x1x256xf32, #tpu.memory_space<vmem>>, vector<1x1x256xf32>
    %12 = vector.shape_cast %11 : vector<1x1x256xf32> to vector<1x256xf32>
    %13 = vector.broadcast %12 : vector<1x256xf32> to vector<2x256xf32>
    %14 = arith.addf %10, %13 : vector<2x256xf32>
    %cst_11 = arith.constant 0.000000e+00 : f32
    %15 = vector.broadcast %cst_11 : f32 to vector<2x256xf32>
    %16 = arith.maximumf %14, %15 : vector<2x256xf32>
    %c0_12 = arith.constant 0 : index
    %c0_13 = arith.constant 0 : index
    %c0_14 = arith.constant 0 : index
    %17 = vector.load %arg5[%c0_12, %c0_13, %c0_14] : memref<3x256x256xf32, #tpu.memory_space<vmem>>, vector<1x256x256xf32>
    %18 = vector.shape_cast %17 : vector<1x256x256xf32> to vector<256x256xf32>
    %cst_15 = arith.constant dense<0.000000e+00> : vector<2x256xf32>
    %19 = tpu.matmul %16, %18, %cst_15 {dimension_numbers = #tpu.dot_dimension_numbers<[1], [0], [0], [1], [0, 0, 1, 1], [], []>} : vector<2x256xf32>, vector<256x256xf32>, vector<2x256xf32> -> vector<2x256xf32>
    %c0_16 = arith.constant 0 : index
    %c0_17 = arith.constant 0 : index
    %c0_18 = arith.constant 0 : index
    %20 = vector.load %arg6[%c0_16, %c0_17, %c0_18] : memref<3x1x256xf32, #tpu.memory_space<vmem>>, vector<1x1x256xf32>
    %21 = vector.shape_cast %20 : vector<1x1x256xf32> to vector<1x256xf32>
    %22 = vector.broadcast %21 : vector<1x256xf32> to vector<2x256xf32>
    %23 = arith.addf %19, %22 : vector<2x256xf32>
    %cst_19 = arith.constant 0.000000e+00 : f32
    %24 = vector.broadcast %cst_19 : f32 to vector<2x256xf32>
    %25 = arith.maximumf %23, %24 : vector<2x256xf32>
    %c0_20 = arith.constant 0 : index
    %c0_21 = arith.constant 0 : index
    %c0_22 = arith.constant 0 : index
    %26 = vector.load %arg7[%c0_20, %c0_21, %c0_22] : memref<3x1x256xf32, #tpu.memory_space<vmem>>, vector<1x1x256xf32>
    %27 = vector.shape_cast %26 : vector<1x1x256xf32> to vector<1x256xf32>
    %28 = vector.broadcast %27 : vector<1x256xf32> to vector<2x256xf32>
    %29 = arith.mulf %25, %28 : vector<2x256xf32>
    %cst_23 = arith.constant dense<0.000000e+00> : vector<2xf32>
    %30 = vector.multi_reduction <add>, %29, %cst_23 [1] : vector<2x256xf32> to vector<2xf32>
    %31 = vector.shape_cast %30 : vector<2xf32> to vector<2x1xf32>
    %c0_i32 = arith.constant 0 : i32
    %32 = vector.broadcast %c0_i32 : i32 to vector<1x3xi32>
    %33 = arith.cmpi eq, %2, %32 : vector<1x3xi32>
    %34 = vector.shape_cast %33 : vector<1x3xi1> to vector<1x3xi1>
    %35 = vector.broadcast %34 : vector<1x3xi1> to vector<2x3xi1>
    %36 = vector.shape_cast %31 : vector<2x1xf32> to vector<2x1xf32>
    %37 = vector.broadcast %36 : vector<2x1xf32> to vector<2x3xf32>
    %38 = arith.select %35, %37, %3 : vector<2x3xi1>, vector<2x3xf32>
    %c1 = arith.constant 1 : index
    %c0_24 = arith.constant 0 : index
    %c0_25 = arith.constant 0 : index
    %39 = vector.load %arg3[%c1, %c0_24, %c0_25] : memref<3x24x256xf32, #tpu.memory_space<vmem>>, vector<1x24x256xf32>
    %40 = vector.shape_cast %39 : vector<1x24x256xf32> to vector<24x256xf32>
    %41 = vector.extract_strided_slice %40 {offsets = [0, 0], sizes = [16, 256], strides = [1, 1]} : vector<24x256xf32> to vector<16x256xf32>
    %cst_26 = arith.constant dense<0.000000e+00> : vector<2x256xf32>
    %42 = tpu.matmul %0, %41, %cst_26 {dimension_numbers = #tpu.dot_dimension_numbers<[1], [0], [0], [1], [0, 0, 1, 1], [], []>} : vector<2x16xf32>, vector<16x256xf32>, vector<2x256xf32> -> vector<2x256xf32>
    %43 = vector.extract_strided_slice %40 {offsets = [16, 0], sizes = [8, 256], strides = [1, 1]} : vector<24x256xf32> to vector<8x256xf32>
    %cst_27 = arith.constant dense<0.000000e+00> : vector<2x256xf32>
    %44 = tpu.matmul %1, %43, %cst_27 {dimension_numbers = #tpu.dot_dimension_numbers<[1], [0], [0], [1], [0, 0, 1, 1], [], []>} : vector<2x8xf32>, vector<8x256xf32>, vector<2x256xf32> -> vector<2x256xf32>
    %45 = arith.addf %42, %44 : vector<2x256xf32>
    %c1_28 = arith.constant 1 : index
    %c0_29 = arith.constant 0 : index
    %c0_30 = arith.constant 0 : index
    %46 = vector.load %arg4[%c1_28, %c0_29, %c0_30] : memref<3x1x256xf32, #tpu.memory_space<vmem>>, vector<1x1x256xf32>
    %47 = vector.shape_cast %46 : vector<1x1x256xf32> to vector<1x256xf32>
    %48 = vector.broadcast %47 : vector<1x256xf32> to vector<2x256xf32>
    %49 = arith.addf %45, %48 : vector<2x256xf32>
    %cst_31 = arith.constant 0.000000e+00 : f32
    %50 = vector.broadcast %cst_31 : f32 to vector<2x256xf32>
    %51 = arith.maximumf %49, %50 : vector<2x256xf32>
    %c1_32 = arith.constant 1 : index
    %c0_33 = arith.constant 0 : index
    %c0_34 = arith.constant 0 : index
    %52 = vector.load %arg5[%c1_32, %c0_33, %c0_34] : memref<3x256x256xf32, #tpu.memory_space<vmem>>, vector<1x256x256xf32>
    %53 = vector.shape_cast %52 : vector<1x256x256xf32> to vector<256x256xf32>
    %cst_35 = arith.constant dense<0.000000e+00> : vector<2x256xf32>
    %54 = tpu.matmul %51, %53, %cst_35 {dimension_numbers = #tpu.dot_dimension_numbers<[1], [0], [0], [1], [0, 0, 1, 1], [], []>} : vector<2x256xf32>, vector<256x256xf32>, vector<2x256xf32> -> vector<2x256xf32>
    %c1_36 = arith.constant 1 : index
    %c0_37 = arith.constant 0 : index
    %c0_38 = arith.constant 0 : index
    %55 = vector.load %arg6[%c1_36, %c0_37, %c0_38] : memref<3x1x256xf32, #tpu.memory_space<vmem>>, vector<1x1x256xf32>
    %56 = vector.shape_cast %55 : vector<1x1x256xf32> to vector<1x256xf32>
    %57 = vector.broadcast %56 : vector<1x256xf32> to vector<2x256xf32>
    %58 = arith.addf %54, %57 : vector<2x256xf32>
    %cst_39 = arith.constant 0.000000e+00 : f32
    %59 = vector.broadcast %cst_39 : f32 to vector<2x256xf32>
    %60 = arith.maximumf %58, %59 : vector<2x256xf32>
    %c1_40 = arith.constant 1 : index
    %c0_41 = arith.constant 0 : index
    %c0_42 = arith.constant 0 : index
    %61 = vector.load %arg7[%c1_40, %c0_41, %c0_42] : memref<3x1x256xf32, #tpu.memory_space<vmem>>, vector<1x1x256xf32>
    %62 = vector.shape_cast %61 : vector<1x1x256xf32> to vector<1x256xf32>
    %63 = vector.broadcast %62 : vector<1x256xf32> to vector<2x256xf32>
    %64 = arith.mulf %60, %63 : vector<2x256xf32>
    %cst_43 = arith.constant dense<0.000000e+00> : vector<2xf32>
    %65 = vector.multi_reduction <add>, %64, %cst_43 [1] : vector<2x256xf32> to vector<2xf32>
    %66 = vector.shape_cast %65 : vector<2xf32> to vector<2x1xf32>
    %c1_i32 = arith.constant 1 : i32
    %67 = vector.broadcast %c1_i32 : i32 to vector<1x3xi32>
    %68 = arith.cmpi eq, %2, %67 : vector<1x3xi32>
    %69 = vector.shape_cast %68 : vector<1x3xi1> to vector<1x3xi1>
    %70 = vector.broadcast %69 : vector<1x3xi1> to vector<2x3xi1>
    %71 = vector.shape_cast %66 : vector<2x1xf32> to vector<2x1xf32>
    %72 = vector.broadcast %71 : vector<2x1xf32> to vector<2x3xf32>
    %73 = arith.select %70, %72, %38 : vector<2x3xi1>, vector<2x3xf32>
    %c2 = arith.constant 2 : index
    %c0_44 = arith.constant 0 : index
    %c0_45 = arith.constant 0 : index
    %74 = vector.load %arg3[%c2, %c0_44, %c0_45] : memref<3x24x256xf32, #tpu.memory_space<vmem>>, vector<1x24x256xf32>
    %75 = vector.shape_cast %74 : vector<1x24x256xf32> to vector<24x256xf32>
    %76 = vector.extract_strided_slice %75 {offsets = [0, 0], sizes = [16, 256], strides = [1, 1]} : vector<24x256xf32> to vector<16x256xf32>
    %cst_46 = arith.constant dense<0.000000e+00> : vector<2x256xf32>
    %77 = tpu.matmul %0, %76, %cst_46 {dimension_numbers = #tpu.dot_dimension_numbers<[1], [0], [0], [1], [0, 0, 1, 1], [], []>} : vector<2x16xf32>, vector<16x256xf32>, vector<2x256xf32> -> vector<2x256xf32>
    %78 = vector.extract_strided_slice %75 {offsets = [16, 0], sizes = [8, 256], strides = [1, 1]} : vector<24x256xf32> to vector<8x256xf32>
    %cst_47 = arith.constant dense<0.000000e+00> : vector<2x256xf32>
    %79 = tpu.matmul %1, %78, %cst_47 {dimension_numbers = #tpu.dot_dimension_numbers<[1], [0], [0], [1], [0, 0, 1, 1], [], []>} : vector<2x8xf32>, vector<8x256xf32>, vector<2x256xf32> -> vector<2x256xf32>
    %80 = arith.addf %77, %79 : vector<2x256xf32>
    %c2_48 = arith.constant 2 : index
    %c0_49 = arith.constant 0 : index
    %c0_50 = arith.constant 0 : index
    %81 = vector.load %arg4[%c2_48, %c0_49, %c0_50] : memref<3x1x256xf32, #tpu.memory_space<vmem>>, vector<1x1x256xf32>
    %82 = vector.shape_cast %81 : vector<1x1x256xf32> to vector<1x256xf32>
    %83 = vector.broadcast %82 : vector<1x256xf32> to vector<2x256xf32>
    %84 = arith.addf %80, %83 : vector<2x256xf32>
    %cst_51 = arith.constant 0.000000e+00 : f32
    %85 = vector.broadcast %cst_51 : f32 to vector<2x256xf32>
    %86 = arith.maximumf %84, %85 : vector<2x256xf32>
    %c2_52 = arith.constant 2 : index
    %c0_53 = arith.constant 0 : index
    %c0_54 = arith.constant 0 : index
    %87 = vector.load %arg5[%c2_52, %c0_53, %c0_54] : memref<3x256x256xf32, #tpu.memory_space<vmem>>, vector<1x256x256xf32>
    %88 = vector.shape_cast %87 : vector<1x256x256xf32> to vector<256x256xf32>
    %cst_55 = arith.constant dense<0.000000e+00> : vector<2x256xf32>
    %89 = tpu.matmul %86, %88, %cst_55 {dimension_numbers = #tpu.dot_dimension_numbers<[1], [0], [0], [1], [0, 0, 1, 1], [], []>} : vector<2x256xf32>, vector<256x256xf32>, vector<2x256xf32> -> vector<2x256xf32>
    %c2_56 = arith.constant 2 : index
    %c0_57 = arith.constant 0 : index
    %c0_58 = arith.constant 0 : index
    %90 = vector.load %arg6[%c2_56, %c0_57, %c0_58] : memref<3x1x256xf32, #tpu.memory_space<vmem>>, vector<1x1x256xf32>
    %91 = vector.shape_cast %90 : vector<1x1x256xf32> to vector<1x256xf32>
    %92 = vector.broadcast %91 : vector<1x256xf32> to vector<2x256xf32>
    %93 = arith.addf %89, %92 : vector<2x256xf32>
    %cst_59 = arith.constant 0.000000e+00 : f32
    %94 = vector.broadcast %cst_59 : f32 to vector<2x256xf32>
    %95 = arith.maximumf %93, %94 : vector<2x256xf32>
    %c2_60 = arith.constant 2 : index
    %c0_61 = arith.constant 0 : index
    %c0_62 = arith.constant 0 : index
    %96 = vector.load %arg7[%c2_60, %c0_61, %c0_62] : memref<3x1x256xf32, #tpu.memory_space<vmem>>, vector<1x1x256xf32>
    %97 = vector.shape_cast %96 : vector<1x1x256xf32> to vector<1x256xf32>
    %98 = vector.broadcast %97 : vector<1x256xf32> to vector<2x256xf32>
    %99 = arith.mulf %95, %98 : vector<2x256xf32>
    %cst_63 = arith.constant dense<0.000000e+00> : vector<2xf32>
    %100 = vector.multi_reduction <add>, %99, %cst_63 [1] : vector<2x256xf32> to vector<2xf32>
    %101 = vector.shape_cast %100 : vector<2xf32> to vector<2x1xf32>
    %c2_i32 = arith.constant 2 : i32
    %102 = vector.broadcast %c2_i32 : i32 to vector<1x3xi32>
    %103 = arith.cmpi eq, %2, %102 : vector<1x3xi32>
    %104 = vector.shape_cast %103 : vector<1x3xi1> to vector<1x3xi1>
    %105 = vector.broadcast %104 : vector<1x3xi1> to vector<2x3xi1>
    %106 = vector.shape_cast %101 : vector<2x1xf32> to vector<2x1xf32>
    %107 = vector.broadcast %106 : vector<2x1xf32> to vector<2x3xf32>
    %108 = arith.select %105, %107, %73 : vector<2x3xi1>, vector<2x3xf32>
    %c0_64 = arith.constant 0 : index
    %c0_65 = arith.constant 0 : index
    %109 = vector.load %arg8[%c0_64, %c0_65] : memref<1x3xf32, #tpu.memory_space<vmem>>, vector<1x3xf32>
    %110 = vector.broadcast %109 : vector<1x3xf32> to vector<2x3xf32>
    %111 = arith.addf %108, %110 : vector<2x3xf32>
    %c0_66 = arith.constant 0 : index
    %c0_67 = arith.constant 0 : index
    %112 = vector.load %arg9[%c0_66, %c0_67] : memref<2x3xf32, #tpu.memory_space<vmem>>, vector<2x3xf32>
    tpu.vector_store %arg9[%c0_66, %c0_67], %111 {strides = array<i32>} : memref<2x3xf32, #tpu.memory_space<vmem>>, vector<2x3xf32>,
    return
  }
  func.func @transform_0(%arg0: i32) -> (i32, i32) {
    %c0_i32 = arith.constant 0 : i32
    %c0_i32_0 = arith.constant 0 : i32
    return %arg0, %c0_i32 : i32, i32
  }
  func.func @transform_1(%arg0: i32) -> (i32, i32) {
    %c0_i32 = arith.constant 0 : i32
    %c0_i32_0 = arith.constant 0 : i32
    return %arg0, %c0_i32 : i32, i32
  }
  func.func @transform_2(%arg0: i32) -> (i32, i32, i32) {
    %c0_i32 = arith.constant 0 : i32
    %c0_i32_0 = arith.constant 0 : i32
    %c0_i32_1 = arith.constant 0 : i32
    %c0_i32_2 = arith.constant 0 : i32
    return %c0_i32, %c0_i32_0, %c0_i32_1 : i32, i32, i32
  }
  func.func @transform_3(%arg0: i32) -> (i32, i32, i32) {
    %c0_i32 = arith.constant 0 : i32
    %c0_i32_0 = arith.constant 0 : i32
    %c0_i32_1 = arith.constant 0 : i32
    %c0_i32_2 = arith.constant 0 : i32
    return %c0_i32, %c0_i32_0, %c0_i32_1 : i32, i32, i32
  }
  func.func @transform_4(%arg0: i32) -> (i32, i32, i32) {
    %c0_i32 = arith.constant 0 : i32
    %c0_i32_0 = arith.constant 0 : i32
    %c0_i32_1 = arith.constant 0 : i32
    %c0_i32_2 = arith.constant 0 : i32
    return %c0_i32, %c0_i32_0, %c0_i32_1 : i32, i32, i32
  }
  func.func @transform_5(%arg0: i32) -> (i32, i32, i32) {
    %c0_i32 = arith.constant 0 : i32
    %c0_i32_0 = arith.constant 0 : i32
    %c0_i32_1 = arith.constant 0 : i32
    %c0_i32_2 = arith.constant 0 : i32
    return %c0_i32, %c0_i32_0, %c0_i32_1 : i32, i32, i32
  }
  func.func @transform_6(%arg0: i32) -> (i32, i32, i32) {
    %c0_i32 = arith.constant 0 : i32
    %c0_i32_0 = arith.constant 0 : i32
    %c0_i32_1 = arith.constant 0 : i32
    %c0_i32_2 = arith.constant 0 : i32
    return %c0_i32, %c0_i32_0, %c0_i32_1 : i32, i32, i32
  }
  func.func @transform_7(%arg0: i32) -> (i32, i32) {
    %c0_i32 = arith.constant 0 : i32
    %c0_i32_0 = arith.constant 0 : i32
    %c0_i32_1 = arith.constant 0 : i32
    return %c0_i32, %c0_i32_0 : i32, i32
  }
  func.func @transform_8(%arg0: i32) -> (i32, i32) {
    %c0_i32 = arith.constant 0 : i32
    %c0_i32_0 = arith.constant 0 : i32
    return %arg0, %c0_i32 : i32, i32
  }
}

</mosaic_0001>

<bundles_post_ra>
// kernel: tpu_custom_call.1
= control target key start
LH: loop header
LB: loop body
LE: loop exit
PB: predicated region body
PF: predicated region fallthrough
CT: control target
= control target key end

     0   :  { %13 = vsyncpa [#allocation3], 0  ;;  %s1683_s0 = inlined_call_operand.hbm [shape: f32[2,16], index: 0, kind: input, shape index: {}]   ;;  %s1684_s1 = inlined_call_operand.hbm [shape: f32[2,8], index: 1, kind: input, shape index: {}]   ;;  %s1685_s2 = inlined_call_operand.hbm [shape: f32[3,24,256], index: 2, kind: input, shape index: {}]   ;;  %s1686_s3 = inlined_call_operand.vmem [shape: f32[3,1,256], index: 3, kind: input, shape index: {}]   ;;  %s1687_s4 = inlined_call_operand.hbm [shape: f32[3,256,256], index: 4, kind: input, shape index: {}]   ;;  %s1688_s5 = inlined_call_operand.vmem [shape: f32[3,1,256], index: 5, kind: input, shape index: {}]   ;;  %s1689_s6 = inlined_call_operand.vmem [shape: f32[3,1,256], index: 6, kind: input, shape index: {}]   ;;  %s1690_s7 = inlined_call_operand.vmem [shape: f32[1,3], index: 7, kind: input, shape index: {}]   ;;  %s1691_s8 = inlined_call_operand.hbm [shape: f32[2,3], index: 8, kind: output, shape index: {}]  }
   0x1   :  { %14 = vsyncpa [#allocation6], 0 }
   0x2   :  { %15 = vsyncpa [#allocation9], 0 }
   0x3   :  { %16 = vsyncpa [#allocation4], 0  ;;  %s1488_s27 = smov [#allocation5]   ;;  %s1489_s29 = smov [#allocation2]  }
   0x4   :  { %s33_s28 = sshll.u32 %s1488_s27, 4  ;;  %s23_s30 = sshll.u32 %s1489_s29, 4  ;;  %s34_s28 = int_to_ptr.vmem [resolvable:$true] %s33_s28  ;;  %s24_s30 = int_to_ptr.vmem [resolvable:$true] %s23_s30 }
   0x5   :  { %s1370_s11 = scalar_lea.hbm %s1684_s1, 32 }
   0x6   :  { %p1371_p0 = scmp.ne.s32.totalorder %s1684_s1, %s1370_s11  ;;  %p1374_p1 = scmp.lt.u32.totalorder %s1370_s11, %s1684_s1 }
   0x8   :  { %p1376_p2 = pnand %p1374_p1, %p1371_p0 }
   0xa   :  { %1379 = shalt.err (!%p1376_p2)
}
   0xb   :  { %s1380_s16 = scalar_lea.vmem %s34_s28, 32  ;;  %p1385_p4 = scmp.lt.s32.totalorder %s34_s28, %s34_s28 }
   0xc   :  { %p1381_p3 = scmp.ne.s32.totalorder %s34_s28, %s1380_s16  ;;  %p1386_p5 = scmp.lt.s32.totalorder %s1380_s16, %s1380_s16 }
   0xe   :  { %p1387_p6 = por %p1386_p5, %p1385_p4 }
  0x10   :  { %p1388_p7 = pnand %p1387_p6, %p1381_p3 }
  0x12   :  { %1391 = shalt.err (!%p1388_p7)
}
  0x13   :  { %36 = dma.hbm_to_vmem [thread:$0]  %s1684_s1, 32, %s34_s28, [#allocation6]  }
  0x14   :  { %s1392_s21 = scalar_lea.hbm %s1683_s0, 32 }
  0x15   :  { %p1393_p8 = scmp.ne.s32.totalorder %s1683_s0, %s1392_s21  ;;  %p1396_p9 = scmp.lt.u32.totalorder %s1392_s21, %s1683_s0 }
  0x17   :  { %p1398_p10 = pnand %p1396_p9, %p1393_p8 }
  0x19   :  { %1401 = shalt.err (!%p1398_p10)
}
  0x1a   :  { %s1402_s26 = scalar_lea.vmem %s24_s30, 32  ;;  %p1407_p12 = scmp.lt.s32.totalorder %s24_s30, %s24_s30 }
  0x1b   :  { %p1403_p11 = scmp.ne.s32.totalorder %s24_s30, %s1402_s26  ;;  %p1408_p13 = scmp.lt.s32.totalorder %s1402_s26, %s1402_s26 }
  0x1d   :  { %p1409_p0 = por %p1408_p13, %p1407_p12 }
  0x1f   :  { %p1410_p1 = pnand %p1409_p0, %p1403_p11 }
  0x21   :  { %1413 = shalt.err (!%p1410_p1)
}
  0x22   :  { %26 = dma.hbm_to_vmem [thread:$0]  %s1683_s0, 32, %s24_s30, [#allocation3]  }
  0x23   :  { %s1490_s28 = smov [#allocation7]   ;;  %s1414_s11 = scalar_lea.hbm %s1685_s2, 2304 }
  0x24   :  { %s42_s29 = sshll.u32 %s1490_s28, 4  ;;  %p1415_p2 = scmp.ne.s32.totalorder %s1685_s2, %s1414_s11  ;;  %s43_s29 = int_to_ptr.vmem [resolvable:$true] %s42_s29 }
  0x25   :  { %p1418_p3 = scmp.lt.u32.totalorder %s1414_s11, %s1685_s2 }
  0x27   :  { %p1420_p4 = pnand %p1418_p3, %p1415_p2 }
  0x29   :  { %1423 = shalt.err (!%p1420_p4)
}
  0x2a   :  { %s1424_s16 = scalar_lea.vmem %s43_s29, 2304  ;;  %p1429_p6 = scmp.lt.s32.totalorder %s43_s29, %s43_s29 }
  0x2b   :  { %p1425_p5 = scmp.ne.s32.totalorder %s43_s29, %s1424_s16  ;;  %p1430_p7 = scmp.lt.s32.totalorder %s1424_s16, %s1424_s16 }
  0x2d   :  { %p1431_p8 = por %p1430_p7, %p1429_p6 }
  0x2f   :  { %p1432_p9 = pnand %p1431_p8, %p1425_p5 }
  0x31   :  { %1435 = shalt.err (!%p1432_p9)
}
  0x32   :  { %s1491_s0 = smov 256   ;;  %s1492_s30 = smov 16  }
  0x33   :  { %48 = dma.hbm_to_vmem [thread:$0]  %s1685_s2, 2304, %s43_s29, [#allocation6], %s1491_s0, %s1491_s0, %s1492_s30  }
  0x34   :  { %s1493_s19 = smov [#allocation8]   ;;  %s1436_s23 = scalar_lea.hbm %s1687_s4, 24576 }
  0x35   :  { %s56_s20 = sshll.u32 %s1493_s19, 4  ;;  %p1437_p10 = scmp.ne.s32.totalorder %s1687_s4, %s1436_s23  ;;  %s57_s20 = int_to_ptr.vmem [resolvable:$true] %s56_s20 }
  0x36   :  { %p1440_p11 = scmp.lt.u32.totalorder %s1436_s23, %s1687_s4 }
  0x38   :  { %p1442_p12 = pnand %p1440_p11, %p1437_p10 }
  0x3a   :  { %1445 = shalt.err (!%p1442_p12)
}
  0x3b   :  { %s1446_s27 = scalar_lea.vmem %s57_s20, 24576  ;;  %p1451_p0 = scmp.lt.s32.totalorder %s57_s20, %s57_s20 }
  0x3c   :  { %p1447_p13 = scmp.ne.s32.totalorder %s57_s20, %s1446_s27  ;;  %p1452_p1 = scmp.lt.s32.totalorder %s1446_s27, %s1446_s27 }
  0x3e   :  { %p1453_p2 = por %p1452_p1, %p1451_p0 }
  0x40   :  { %p1454_p3 = pnand %p1453_p2, %p1447_p13 }
  0x42   :  { %1457 = shalt.err (!%p1454_p3)
}
  0x43   :  { %62 = dma.hbm_to_vmem [thread:$0]  %s1687_s4, 24576, %s57_s20, [#allocation9], %s1491_s0, %s1491_s0, %s1492_s30  }
  0x44   :  { %1480 = dma.done.wait [#allocation3], 32  }
  0x45   :  { %1481 = vsyncadd [#allocation3], 4294967264 }
  0x46   :  { %1482 = dma.done.wait [#allocation6], 2336  }
  0x47   :  { %1483 = vsyncadd [#allocation6], 4294964960 }
  0x48   :  { %1484 = dma.done.wait [#allocation9], 24576  }
  0x49   :  { %1485 = vsyncadd [#allocation9], 4294942720  ;;  %v1494_v0 = vmov 0.0   ;;  %v90_v1 = vld [vmem:[#allocation7 + $0x28] sm:$0xff]  ;;  %v89_v2 = vld [vmem:[#allocation7 + $0x20] sm:$0xff]  ;;  %vm91_vm0 = vcmask 64512  }
  0x4a   :  { %159 = vmatprep.mubr.f32.mxu0 %v1494_v0  ;;  %v1590_v3 = vld [vmem:[#allocation5] sm:$0x3]  ;;  %95 = vmatprep.subr.mxu0 %v90_v1  ;;  %v86_v4 = vld [vmem:[#allocation7 + $0x8] sm:$0xff]  ;;  %v85_v6 = vld [vmem:[#allocation7] sm:$0xff]  ;;  %vm166_vm1 = vcmask 130048   ;;  %vm420_vm2 = vcmask 1041408  }
  0x4b   :  { %v88_v5 = vld [vmem:[#allocation7 + $0x18] sm:$0xff]  ;;  %96 = vmatpush1.msra.mxu0 %v89_v2  ;;  %v87_v8 = vld [vmem:[#allocation7 + $0x10] sm:$0xff]  ;;  %v434_v12 = vld [vmem:[#allocation7 + $0x48] sm:$0xff]  ;;  %s1495_s22 = smov [#allocation10]   ;;  %vm1120_vm6 = vcmask 17408  }
  0x4c   :  { %v1152_v7 = vpack.c.bf16 %v88_v5, %v86_v4  ;;  %1139 = vmatmul.mubr.msk.f32.vlgmr.msra.gmra.mrb[0].mxu0 %vm91_vm0, %v1590_v3  ;;  %v1154_v9 = vpack.c.bf16 %v87_v8, %v85_v6  ;;  %v436_v10 = vld [vmem:[#allocation7 + $0x58] sm:$0xff]  ;;  %v260_v14 = vld [vmem:[#allocation8 + $0x18] sm:$0xff]  ;;  %v257_v15 = vld [vmem:[#allocation8] sm:$0xff]  ;;  %s1128_s23 = sshll.u32 %s1495_s22, 4  ;;  %s1129_s23 = int_to_ptr.vmem [resolvable:$true] %s1128_s23 }
  0x4d   :  { %234 = vmatprep.mubr.f32.mxu0 %v1494_v0  ;;  %v432_v11 = vld [vmem:[#allocation7 + $0x38] sm:$0xff]  ;;  %v259_v16 = vld [vmem:[#allocation8 + $0x10] sm:$0xff]  ;;  %v264_v20 = vld [vmem:[#allocation8 + $0x38] sm:$0xff]  ;;  %s1458_s24 = scalar_lea.vmem %s1129_s23, 32  ;;  %p1463_p5 = scmp.lt.s32.totalorder %s1129_s23, %s1129_s23 }
  0x4e   :  { %1153 = vmatprep.subr.bf16.mxu0 %v1152_v7  ;;  %v258_v13 = vld [vmem:[#allocation8 + $0x8] sm:$0xff]  ;;  %v1158_v18 = vpack.c.bf16 %v259_v16, %v257_v15  ;;  %v261_v21 = vld [vmem:[#allocation8 + $0x20] sm:$0xff]  ;;  %v263_v23 = vld [vmem:[#allocation8 + $0x30] sm:$0xff]  ;;  %v1220_v28 = vpack.c.bf16 %v434_v12, %v432_v11  ;;  %p1459_p4 = scmp.ne.s32.totalorder %s1129_s23, %s1458_s24  ;;  %p1464_p6 = scmp.lt.s32.totalorder %s1458_s24, %s1458_s24 }
  0x4f   :  { %1155 = vmatpush1.bf16.msra.mxu0 %v1154_v9  ;;  %v1156_v17 = vpack.c.bf16 %v260_v14, %v258_v13  ;;  %v262_v19 = vld [vmem:[#allocation8 + $0x28] sm:$0xff]  ;;  %v268_v25 = vld [vmem:[#allocation8 + $0x58] sm:$0xff]  ;;  %v435_v27 = vld [vmem:[#allocation7 + $0x50] sm:$0xff]  ;;  %v1162_v31 = vpack.c.bf16 %v263_v23, %v261_v21 }
  0x50   :  { %437 = vmatprep.subr.mxu0 %v436_v10  ;;  %v1160_v22 = vpack.c.bf16 %v264_v20, %v262_v19  ;;  %v266_v24 = vld [vmem:[#allocation8 + $0x48] sm:$0xff]  ;;  %v431_v29 = vld [vmem:[#allocation7 + $0x30] sm:$0xff]  ;;  %v433_v30 = vld [vmem:[#allocation7 + $0x40] sm:$0xff]  ;;  %p1465_p7 = por %p1464_p6, %p1463_p5 }
  0x51   :  { %v1595_v26 = vld [vmem:[#allocation2] sm:$0x3]  ;;  %1157 = vmatprep.subr.bf16.mxu1 %v1156_v17  ;;  %v265_v32 = vld [vmem:[#allocation8 + $0x40] sm:$0xff]  ;;  %v1164_v33 = vpack.c.bf16 %v268_v25, %v266_v24  ;;  %v267_v34 = vld [vmem:[#allocation8 + $0x50] sm:$0xff]  ;;  %v1222_v39 = vpack.c.bf16 %v433_v30, %v431_v29 }
  0x52   :  { %1159 = vmatpush1.bf16.msra.mxu1 %v1158_v18  ;;  %v598_v35 = vld [vmem:[#allocation8 + $0x208] sm:$0xff]  ;;  %v600_v36 = vld [vmem:[#allocation8 + $0x218] sm:$0xff]  ;;  %v1166_v40 = vpack.c.bf16 %v267_v34, %v265_v32  ;;  %v269_v43 = vld [vmem:[#allocation8 + $0x60] sm:$0xff]  ;;  %p1466_p8 = pnand %p1465_p7, %p1459_p4 }
  0x53   :  { %1161 = vmatprep.subr.bf16.mxu1 %v1160_v22  ;;  %v270_v37 = vld [vmem:[#allocation8 + $0x68] sm:$0xff]  ;;  %v272_v38 = vld [vmem:[#allocation8 + $0x78] sm:$0xff]  ;;  %v1224_v41 = vpack.c.bf16 %v600_v36, %v598_v35  ;;  %v271_v44 = vld [vmem:[#allocation8 + $0x70] sm:$0xff] }
  0x54   :  { %1140 = vmatmul.mubr.msk.f32.vlgmr.msra.gmra.mrb[0].mxu0 %vm166_vm1, %v1595_v26  ;;  %v1168_v42 = vpack.c.bf16 %v272_v38, %v270_v37  ;;  %v274_v45 = vld [vmem:[#allocation8 + $0x88] sm:$0xff]  ;;  %v276_v46 = vld [vmem:[#allocation8 + $0x98] sm:$0xff]  ;;  %v1170_v47 = vpack.c.bf16 %v271_v44, %v269_v43  ;;  %v597_v48 = vld [vmem:[#allocation8 + $0x200] sm:$0xff] }
  0x55   :  { %438 = vmatpush1.msra.mxu0 %v435_v27  ;;  %501 = vmatprep.mubr.f32.mxu0 %v1494_v0  ;;  %v599_v49 = vld [vmem:[#allocation8 + $0x210] sm:$0xff]  ;;  %v602_v50 = vld [vmem:[#allocation8 + $0x228] sm:$0xff]  ;;  %v1172_v51 = vpack.c.bf16 %v276_v46, %v274_v45  ;;  %v604_v52 = vld [vmem:[#allocation8 + $0x238] sm:$0xff] }
  0x56   :  { %1221 = vmatprep.subr.bf16.mxu0 %v1220_v28  ;;  %1163 = vmatpush1.bf16.msra.mxu1 %v1162_v31  ;;  %v273_v53 = vld [vmem:[#allocation8 + $0x80] sm:$0xff]  ;;  %v275_v54 = vld [vmem:[#allocation8 + $0x90] sm:$0xff]  ;;  %v278_v55 = vld [vmem:[#allocation8 + $0xa8] sm:$0xff]  ;;  %v1226_v57 = vpack.c.bf16 %v599_v49, %v597_v48  ;;  %v1228_v58 = vpack.c.bf16 %v604_v52, %v602_v50 }
  0x57   :  { %1165 = vmatprep.subr.bf16.mxu1 %v1164_v33  ;;  %v280_v56 = vld [vmem:[#allocation8 + $0xb8] sm:$0xff]  ;;  %v1174_v59 = vpack.c.bf16 %v275_v54, %v273_v53  ;;  %v601_v60 = vld [vmem:[#allocation8 + $0x220] sm:$0xff]  ;;  %v603_v61 = vld [vmem:[#allocation8 + $0x230] sm:$0xff] }
  0x58   :  { %1141 = vmatmul.mubr.msk.f32.vlgmr.msra.gmra.mrb[2].mxu0 %vm91_vm0, %v1590_v3  ;;  %v606_v62 = vld [vmem:[#allocation8 + $0x248] sm:$0xff]  ;;  %v1176_v63 = vpack.c.bf16 %v280_v56, %v278_v55  ;;  %v608_v1 = vld [vmem:[#allocation8 + $0x258] sm:$0xff]  ;;  %v277_v2 = vld [vmem:[#allocation8 + $0xa0] sm:$0xff]  ;;  %v1230_v7 = vpack.c.bf16 %v603_v61, %v601_v60 }
  0x59   :  { %1223 = vmatpush1.bf16.msra.mxu0 %v1222_v39  ;;  %572 = vmatprep.mubr.f32.mxu0 %v1494_v0  ;;  %v279_v4 = vld [vmem:[#allocation8 + $0xb0] sm:$0xff]  ;;  %v282_v5 = vld [vmem:[#allocation8 + $0xc8] sm:$0xff]  ;;  %v284_v6 = vld [vmem:[#allocation8 + $0xd8] sm:$0xff]  ;;  %v1232_v8 = vpack.c.bf16 %v608_v1, %v606_v62 }
  0x5a   :  { %1167 = vmatpush1.bf16.msra.mxu1 %v1166_v40  ;;  %1225 = vmatprep.subr.bf16.mxu0 %v1224_v41  ;;  %v1178_v9 = vpack.c.bf16 %v279_v4, %v277_v2  ;;  %v605_v10 = vld [vmem:[#allocation8 + $0x240] sm:$0xff]  ;;  %v607_v11 = vld [vmem:[#allocation8 + $0x250] sm:$0xff]  ;;  %v610_v12 = vld [vmem:[#allocation8 + $0x268] sm:$0xff]  ;;  %v1180_v13 = vpack.c.bf16 %v284_v6, %v282_v5 }
  0x5b   :  { %1169 = vmatprep.subr.bf16.mxu1 %v1168_v42  ;;  %v612_v14 = vld [vmem:[#allocation8 + $0x278] sm:$0xff]  ;;  %v281_v15 = vld [vmem:[#allocation8 + $0xc0] sm:$0xff]  ;;  %v283_v16 = vld [vmem:[#allocation8 + $0xd0] sm:$0xff]  ;;  %v1234_v19 = vpack.c.bf16 %v607_v11, %v605_v10 }
  0x5c   :  { %v286_v17 = vld [vmem:[#allocation8 + $0xe8] sm:$0xff]  ;;  %v288_v18 = vld [vmem:[#allocation8 + $0xf8] sm:$0xff]  ;;  %v1236_v20 = vpack.c.bf16 %v612_v14, %v610_v12  ;;  %v1182_v21 = vpack.c.bf16 %v283_v16, %v281_v15  ;;  %v609_v22 = vld [vmem:[#allocation8 + $0x260] sm:$0xff] }
  0x5d   :  { %v611_v23 = vld [vmem:[#allocation8 + $0x270] sm:$0xff]  ;;  %v614_v24 = vld [vmem:[#allocation8 + $0x288] sm:$0xff]  ;;  %v1184_v25 = vpack.c.bf16 %v288_v18, %v286_v17  ;;  %v616_v27 = vld [vmem:[#allocation8 + $0x298] sm:$0xff] }
  0x5e   :  { %1171 = vmatpush1.bf16.msra.mxu1 %v1170_v47  ;;  %v285_v28 = vld [vmem:[#allocation8 + $0xe0] sm:$0xff]  ;;  %v287_v29 = vld [vmem:[#allocation8 + $0xf0] sm:$0xff]  ;;  %v290_v30 = vld [vmem:[#allocation8 + $0x108] sm:$0xff]  ;;  %v1238_v32 = vpack.c.bf16 %v611_v23, %v609_v22  ;;  %v1240_v33 = vpack.c.bf16 %v616_v27, %v614_v24 }
  0x5f   :  { %1173 = vmatprep.subr.bf16.mxu1 %v1172_v51  ;;  %v292_v31 = vld [vmem:[#allocation8 + $0x118] sm:$0xff]  ;;  %v1186_v34 = vpack.c.bf16 %v287_v29, %v285_v28  ;;  %v613_v35 = vld [vmem:[#allocation8 + $0x280] sm:$0xff]  ;;  %v615_v36 = vld [vmem:[#allocation8 + $0x290] sm:$0xff] }
  0x60   :  { %1142 = vmatmul.mubr.msk.f32.vlgmr.msra.gmra.mrb[2].mxu0 %vm166_vm1, %v1595_v26  ;;  %v618_v37 = vld [vmem:[#allocation8 + $0x2a8] sm:$0xff]  ;;  %v1188_v38 = vpack.c.bf16 %v292_v31, %v290_v30  ;;  %v620_v39 = vld [vmem:[#allocation8 + $0x2b8] sm:$0xff]  ;;  %v289_v40 = vld [vmem:[#allocation8 + $0x100] sm:$0xff]  ;;  %v1242_v44 = vpack.c.bf16 %v615_v36, %v613_v35 }
  0x61   :  { %1227 = vmatpush1.bf16.msra.mxu0 %v1226_v57  ;;  %v291_v41 = vld [vmem:[#allocation8 + $0x110] sm:$0xff]  ;;  %v294_v42 = vld [vmem:[#allocation8 + $0x128] sm:$0xff]  ;;  %v296_v43 = vld [vmem:[#allocation8 + $0x138] sm:$0xff]  ;;  %v1244_v45 = vpack.c.bf16 %v620_v39, %v618_v37 }
  0x62   :  { %1229 = vmatprep.subr.bf16.mxu0 %v1228_v58  ;;  %1175 = vmatpush1.bf16.msra.mxu1 %v1174_v59  ;;  %v1190_v46 = vpack.c.bf16 %v291_v41, %v289_v40  ;;  %v617_v47 = vld [vmem:[#allocation8 + $0x2a0] sm:$0xff]  ;;  %v619_v48 = vld [vmem:[#allocation8 + $0x2b0] sm:$0xff]  ;;  %v622_v49 = vld [vmem:[#allocation8 + $0x2c8] sm:$0xff]  ;;  %v1192_v50 = vpack.c.bf16 %v296_v43, %v294_v42 }
  0x63   :  { %1177 = vmatprep.subr.bf16.mxu1 %v1176_v63  ;;  %v624_v51 = vld [vmem:[#allocation8 + $0x2d8] sm:$0xff]  ;;  %v293_v52 = vld [vmem:[#allocation8 + $0x120] sm:$0xff]  ;;  %v295_v53 = vld [vmem:[#allocation8 + $0x130] sm:$0xff]  ;;  %v1246_v56 = vpack.c.bf16 %v619_v48, %v617_v47 }
  0x64   :  { %v298_v54 = vld [vmem:[#allocation8 + $0x148] sm:$0xff]  ;;  %v300_v55 = vld [vmem:[#allocation8 + $0x158] sm:$0xff]  ;;  %v1248_v57 = vpack.c.bf16 %v624_v51, %v622_v49  ;;  %v1194_v58 = vpack.c.bf16 %v295_v53, %v293_v52  ;;  %v621_v59 = vld [vmem:[#allocation8 + $0x2c0] sm:$0xff] }
  0x65   :  { %1231 = vmatpush1.bf16.msra.mxu0 %v1230_v7  ;;  %v623_v60 = vld [vmem:[#allocation8 + $0x2d0] sm:$0xff]  ;;  %v626_v61 = vld [vmem:[#allocation8 + $0x2e8] sm:$0xff]  ;;  %v1196_v62 = vpack.c.bf16 %v300_v55, %v298_v54  ;;  %v628_v63 = vld [vmem:[#allocation8 + $0x2f8] sm:$0xff] }
  0x66   :  { %1233 = vmatprep.subr.bf16.mxu0 %v1232_v8  ;;  %1179 = vmatpush1.bf16.msra.mxu1 %v1178_v9  ;;  %v297_v1 = vld [vmem:[#allocation8 + $0x140] sm:$0xff]  ;;  %v299_v2 = vld [vmem:[#allocation8 + $0x150] sm:$0xff]  ;;  %v302_v4 = vld [vmem:[#allocation8 + $0x168] sm:$0xff]  ;;  %v1250_v6 = vpack.c.bf16 %v623_v60, %v621_v59  ;;  %v1252_v7 = vpack.c.bf16 %v628_v63, %v626_v61 }
  0x67   :  { %1181 = vmatprep.subr.bf16.mxu1 %v1180_v13  ;;  %v304_v5 = vld [vmem:[#allocation8 + $0x178] sm:$0xff]  ;;  %v1198_v8 = vpack.c.bf16 %v299_v2, %v297_v1  ;;  %v625_v9 = vld [vmem:[#allocation8 + $0x2e0] sm:$0xff]  ;;  %v627_v10 = vld [vmem:[#allocation8 + $0x2f0] sm:$0xff] }
  0x68   :  { %v630_v11 = vld [vmem:[#allocation8 + $0x308] sm:$0xff]  ;;  %v1200_v12 = vpack.c.bf16 %v304_v5, %v302_v4  ;;  %v632_v13 = vld [vmem:[#allocation8 + $0x318] sm:$0xff]  ;;  %v301_v14 = vld [vmem:[#allocation8 + $0x160] sm:$0xff]  ;;  %v1254_v18 = vpack.c.bf16 %v627_v10, %v625_v9 }
  0x69   :  { %1235 = vmatpush1.bf16.msra.mxu0 %v1234_v19  ;;  %v303_v15 = vld [vmem:[#allocation8 + $0x170] sm:$0xff]  ;;  %v306_v16 = vld [vmem:[#allocation8 + $0x188] sm:$0xff]  ;;  %v308_v17 = vld [vmem:[#allocation8 + $0x198] sm:$0xff]  ;;  %v1256_v19 = vpack.c.bf16 %v632_v13, %v630_v11 }
  0x6a   :  { %1237 = vmatprep.subr.bf16.mxu0 %v1236_v20  ;;  %1183 = vmatpush1.bf16.msra.mxu1 %v1182_v21  ;;  %v1202_v20 = vpack.c.bf16 %v303_v15, %v301_v14  ;;  %v629_v21 = vld [vmem:[#allocation8 + $0x300] sm:$0xff]  ;;  %v631_v22 = vld [vmem:[#allocation8 + $0x310] sm:$0xff]  ;;  %v634_v23 = vld [vmem:[#allocation8 + $0x328] sm:$0xff]  ;;  %v1204_v24 = vpack.c.bf16 %v308_v17, %v306_v16 }
  0x6b   :  { %1185 = vmatprep.subr.bf16.mxu1 %v1184_v25  ;;  %v636_v25 = vld [vmem:[#allocation8 + $0x338] sm:$0xff]  ;;  %v305_v27 = vld [vmem:[#allocation8 + $0x180] sm:$0xff]  ;;  %v307_v28 = vld [vmem:[#allocation8 + $0x190] sm:$0xff]  ;;  %v1258_v31 = vpack.c.bf16 %v631_v22, %v629_v21 }
  0x6c   :  { %v310_v29 = vld [vmem:[#allocation8 + $0x1a8] sm:$0xff]  ;;  %v312_v30 = vld [vmem:[#allocation8 + $0x1b8] sm:$0xff]  ;;  %v635_v35 = vld [vmem:[#allocation8 + $0x330] sm:$0xff] }
  0x6d   :  { %1239 = vmatpush1.bf16.msra.mxu0 %v1238_v32  ;;  %v1260_v32 = vpack.c.bf16 %v636_v25, %v634_v23  ;;  %v638_v36 = vld [vmem:[#allocation8 + $0x348] sm:$0xff]  ;;  %v1208_v37 = vpack.c.bf16 %v312_v30, %v310_v29  ;;  %v309_v39 = vld [vmem:[#allocation8 + $0x1a0] sm:$0xff]  ;;  %v311_v40 = vld [vmem:[#allocation8 + $0x1b0] sm:$0xff] }
  0x6e   :  { %1241 = vmatprep.subr.bf16.mxu0 %v1240_v33  ;;  %1187 = vmatpush1.bf16.msra.mxu1 %v1186_v34  ;;  %v1206_v33 = vpack.c.bf16 %v307_v28, %v305_v27  ;;  %v633_v34 = vld [vmem:[#allocation8 + $0x320] sm:$0xff]  ;;  %v314_v41 = vld [vmem:[#allocation8 + $0x1c8] sm:$0xff]  ;;  %v316_v42 = vld [vmem:[#allocation8 + $0x1d8] sm:$0xff] }
  0x6f   :  { %1189 = vmatprep.subr.bf16.mxu1 %v1188_v38  ;;  %v640_v38 = vld [vmem:[#allocation8 + $0x358] sm:$0xff]  ;;  %v1262_v43 = vpack.c.bf16 %v635_v35, %v633_v34  ;;  %v639_v47 = vld [vmem:[#allocation8 + $0x350] sm:$0xff]  ;;  %v1212_v48 = vpack.c.bf16 %v316_v42, %v314_v41  ;;  %v642_v49 = vld [vmem:[#allocation8 + $0x368] sm:$0xff] }
  0x70   :  { %v313_v53 = vld [vmem:[#allocation8 + $0x1c0] sm:$0xff]  ;;  %v315_v54 = vld [vmem:[#allocation8 + $0x1d0] sm:$0xff]  ;;  %v318_v59 = vld [vmem:[#allocation8 + $0x1e8] sm:$0xff] }
  0x71   :  { %1243 = vmatpush1.bf16.msra.mxu0 %v1242_v44  ;;  %v1264_v44 = vpack.c.bf16 %v640_v38, %v638_v36  ;;  %v641_v55 = vld [vmem:[#allocation8 + $0x360] sm:$0xff]  ;;  %v320_v60 = vld [vmem:[#allocation8 + $0x1f8] sm:$0xff]  ;;  %v646_v61 = vld [vmem:[#allocation8 + $0x388] sm:$0xff] }
  0x72   :  { %1245 = vmatprep.subr.bf16.mxu0 %v1244_v45  ;;  %1191 = vmatpush1.bf16.msra.mxu1 %v1190_v46  ;;  %v1210_v45 = vpack.c.bf16 %v311_v40, %v309_v39  ;;  %v637_v46 = vld [vmem:[#allocation8 + $0x340] sm:$0xff]  ;;  %v648_v63 = vld [vmem:[#allocation8 + $0x398] sm:$0xff]  ;;  %v319_v2 = vld [vmem:[#allocation8 + $0x1f0] sm:$0xff] }
  0x73   :  { %1193 = vmatprep.subr.bf16.mxu1 %v1192_v50  ;;  %v644_v50 = vld [vmem:[#allocation8 + $0x378] sm:$0xff]  ;;  %v1266_v51 = vpack.c.bf16 %v639_v47, %v637_v46  ;;  %v317_v1 = vld [vmem:[#allocation8 + $0x1e0] sm:$0xff]  ;;  %v1272_v4 = vpack.c.bf16 %v648_v63, %v646_v61  ;;  %v650_v9 = vld [vmem:[#allocation8 + $0x3a8] sm:$0xff] }
  0x74   :  { %v1268_v52 = vpack.c.bf16 %v644_v50, %v642_v49  ;;  %v1218_v5 = vpack.c.bf16 %v319_v2, %v317_v1  ;;  %v652_v10 = vld [vmem:[#allocation8 + $0x3b8] sm:$0xff]  ;;  %v651_v13 = vld [vmem:[#allocation8 + $0x3b0] sm:$0xff]  ;;  %v654_v15 = vld [vmem:[#allocation8 + $0x3c8] sm:$0xff] }
  0x75   :  { %1247 = vmatpush1.bf16.msra.mxu0 %v1246_v56  ;;  %v1214_v56 = vpack.c.bf16 %v315_v54, %v313_v53  ;;  %v1276_v11 = vpack.c.bf16 %v652_v10, %v650_v9  ;;  %v656_v16 = vld [vmem:[#allocation8 + $0x3d8] sm:$0xff]  ;;  %v658_v21 = vld [vmem:[#allocation8 + $0x3e8] sm:$0xff]  ;;  %v659_v25 = vld [vmem:[#allocation8 + $0x3f0] sm:$0xff] }
  0x76   :  { %1249 = vmatprep.subr.bf16.mxu0 %v1248_v57  ;;  %1195 = vmatpush1.bf16.msra.mxu1 %v1194_v58  ;;  %v643_v57 = vld [vmem:[#allocation8 + $0x370] sm:$0xff]  ;;  %v1280_v17 = vpack.c.bf16 %v656_v16, %v654_v15  ;;  %v660_v22 = vld [vmem:[#allocation8 + $0x3f8] sm:$0xff]  ;;  %v939_v29 = vld [vmem:[#allocation8 + $0x408] sm:$0xff] }
  0x77   :  { %1197 = vmatprep.subr.bf16.mxu1 %v1196_v62  ;;  %v1270_v58 = vpack.c.bf16 %v643_v57, %v641_v55  ;;  %v1216_v62 = vpack.c.bf16 %v320_v60, %v318_v59  ;;  %v1284_v23 = vpack.c.bf16 %v660_v22, %v658_v21  ;;  %v777_v28 = vld [vmem:[#allocation7 + $0x88] sm:$0xff]  ;;  %v241_v35 = vld [vmem:[%s1686_s3] sm:$0x3]  ;;  %v938_v42 = vld [vmem:[#allocation8 + $0x400] sm:$0xff] }
  0x78   :  { %v941_v30 = vld [vmem:[#allocation8 + $0x418] sm:$0xff]  ;;  %v1143_v53 = vld [vmem:[%s1686_s3 + $0x2] sm:$0x3]  ;;  %v947_v54 = vld [vmem:[#allocation8 + $0x448] sm:$0xff] }
  0x79   :  { %1251 = vmatpush1.bf16.msra.mxu0 %v1250_v6  ;;  %v645_v6 = vld [vmem:[#allocation8 + $0x380] sm:$0xff]  ;;  %v945_v46 = vld [vmem:[#allocation8 + $0x438] sm:$0xff]  ;;  %v948_v60 = vld [vmem:[#allocation8 + $0x450] sm:$0xff] }
  0x7a   :  { %1253 = vmatprep.subr.bf16.mxu0 %v1252_v7  ;;  %1199 = vmatpush1.bf16.msra.mxu1 %v1198_v8  ;;  %v647_v7 = vld [vmem:[#allocation8 + $0x390] sm:$0xff]  ;;  %v949_v55 = vld [vmem:[#allocation8 + $0x458] sm:$0xff]  ;;  %v946_v59 = vld [vmem:[#allocation8 + $0x440] sm:$0xff] }
  0x7b   :  { %1201 = vmatprep.subr.bf16.mxu1 %v1200_v12  ;;  %v1274_v8 = vpack.c.bf16 %v647_v7, %v645_v6  ;;  %v649_v12 = vld [vmem:[#allocation8 + $0x3a0] sm:$0xff]  ;;  %v953_v63 = vld [vmem:[#allocation8 + $0x478] sm:$0xff]  ;;  %v1302_v2 = vpack.c.bf16 %v948_v60, %v946_v59  ;;  %v775_v9 = vld [vmem:[#allocation7 + $0x78] sm:$0xff] }
  0x7c   :  { %v1278_v14 = vpack.c.bf16 %v651_v13, %v649_v12  ;;  %v773_v6 = vld [vmem:[#allocation7 + $0x68] sm:$0xff]  ;;  %v950_v10 = vld [vmem:[#allocation8 + $0x460] sm:$0xff]  ;;  %v955_v12 = vld [vmem:[#allocation8 + $0x488] sm:$0xff] }
  0x7d   :  { %1255 = vmatpush1.bf16.msra.mxu0 %v1254_v18  ;;  %v653_v18 = vld [vmem:[#allocation8 + $0x3c0] sm:$0xff]  ;;  %v957_v13 = vld [vmem:[#allocation8 + $0x498] sm:$0xff]  ;;  %v776_v16 = vld [vmem:[#allocation7 + $0x80] sm:$0xff] }
  0x7e   :  { %1257 = vmatprep.subr.bf16.mxu0 %v1256_v19  ;;  %1203 = vmatpush1.bf16.msra.mxu1 %v1202_v20  ;;  %v655_v19 = vld [vmem:[#allocation8 + $0x3d0] sm:$0xff]  ;;  %v1308_v21 = vpack.c.bf16 %v957_v13, %v955_v12  ;;  %v954_v22 = vld [vmem:[#allocation8 + $0x480] sm:$0xff]  ;;  %v991_v13 = vld [vmem:[#allocation8 + $0x5a8] sm:$0xff] }
  0x7f   :  { %1205 = vmatprep.subr.bf16.mxu1 %v1204_v24  ;;  %v1282_v20 = vpack.c.bf16 %v655_v19, %v653_v18  ;;  %v657_v24 = vld [vmem:[#allocation8 + $0x3e0] sm:$0xff]  ;;  %v772_v18 = vld [vmem:[#allocation7 + $0x60] sm:$0xff] }
  0x80   :  { %v1286_v27 = vpack.c.bf16 %v659_v25, %v657_v24  ;;  %v774_v19 = vld [vmem:[#allocation7 + $0x70] sm:$0xff]  ;;  %v959_v24 = vld [vmem:[#allocation8 + $0x4a8] sm:$0xff]  ;;  %v961_v25 = vld [vmem:[#allocation8 + $0x4b8] sm:$0xff] }
  0x81   :  { %1259 = vmatpush1.bf16.msra.mxu0 %v1258_v31  ;;  %v1292_v31 = vpack.c.bf16 %v941_v30, %v939_v29  ;;  %v1312_v29 = vpack.c.bf16 %v961_v25, %v959_v24  ;;  %v958_v30 = vld [vmem:[#allocation8 + $0x4a0] sm:$0xff]  ;;  %v999_v25 = vld [vmem:[#allocation8 + $0x5e8] sm:$0xff] }
  0x82   :  { %1261 = vmatprep.subr.bf16.mxu0 %v1260_v32  ;;  %1207 = vmatpush1.bf16.msra.mxu1 %v1206_v33  ;;  %v83_v32 = vlaneseq  ;;  %v978_v59 = vld [vmem:[#allocation8 + $0x540] sm:$0xff] }
  0x83   :  { %1209 = vmatprep.subr.bf16.mxu1 %v1208_v37 }
  0x84   :  { %v244_v33 = vshrl.u32 %v83_v32, 7 }
  0x85   :  { %1263 = vmatpush1.bf16.msra.mxu0 %v1262_v43  ;;  %v940_v43 = vld [vmem:[#allocation8 + $0x410] sm:$0xff] }
  0x86   :  { %1265 = vmatprep.subr.bf16.mxu0 %v1264_v44  ;;  %1211 = vmatpush1.bf16.msra.mxu1 %v1210_v45  ;;  %v1606_v34 = vsub.s32 0, %v244_v33  ;;  %v1611_v36 = vsub.s32 1, %v244_v33  ;;  %v943_v45 = vld [vmem:[#allocation8 + $0x428] sm:$0xff] }
  0x87   :  { %1213 = vmatprep.subr.bf16.mxu1 %v1212_v48  ;;  %v1294_v48 = vpack.c.bf16 %v940_v43, %v938_v42  ;;  %v1296_v50 = vpack.c.bf16 %v945_v46, %v943_v45  ;;  %v963_v33 = vld [vmem:[#allocation8 + $0x4c8] sm:$0xff]  ;;  %v969_v42 = vld [vmem:[#allocation8 + $0x4f8] sm:$0xff]  ;;  %v966_v45 = vld [vmem:[#allocation8 + $0x4e0] sm:$0xff] }
  0x88   :  { %v246_v37 = vrot.slane %v241_v35, %v1606_v34  ;;  %v250_v38 = vrot.slane %v241_v35, %v1611_v36  ;;  %v585_v57 = vrot.slane %v1143_v53, %v1606_v34  ;;  %v589_v61 = vrot.slane %v1143_v53, %v1611_v36  ;;  %v965_v35 = vld [vmem:[#allocation8 + $0x4d8] sm:$0xff]  ;;  %v968_v46 = vld [vmem:[#allocation8 + $0x4f0] sm:$0xff] }
  0x89   :  { %1267 = vmatpush1.bf16.msra.mxu0 %v1266_v51  ;;  %v942_v51 = vld [vmem:[#allocation8 + $0x420] sm:$0xff]  ;;  %v977_v53 = vld [vmem:[#allocation8 + $0x538] sm:$0xff] }
  0x8a   :  { %1269 = vmatprep.subr.bf16.mxu0 %v1268_v52  ;;  %1215 = vmatpush1.bf16.msra.mxu1 %v1214_v56  ;;  %v944_v52 = vld [vmem:[#allocation8 + $0x430] sm:$0xff] }
  0x8b   :  { %1217 = vmatprep.subr.bf16.mxu1 %v1216_v62  ;;  %v1298_v56 = vpack.c.bf16 %v944_v52, %v942_v51  ;;  %v951_v62 = vld [vmem:[#allocation8 + $0x468] sm:$0xff] }
  0x8c   :  { %v1304_v7 = vpack.c.bf16 %v953_v63, %v951_v62  ;;  %v975_v52 = vld [vmem:[#allocation8 + $0x528] sm:$0xff]  ;;  %v985_v63 = vld [vmem:[#allocation8 + $0x578] sm:$0xff] }
  0x8d   :  { %1271 = vmatpush1.bf16.msra.mxu0 %v1270_v58  ;;  %v1300_v58 = vpack.c.bf16 %v949_v55, %v947_v54  ;;  %v1328_v54 = vpack.c.bf16 %v977_v53, %v975_v52  ;;  %v974_v55 = vld [vmem:[#allocation8 + $0x520] sm:$0xff]  ;;  %v983_v62 = vld [vmem:[#allocation8 + $0x568] sm:$0xff]  ;;  %v1145_v52 = vld [vmem:[%s1689_s6 + $0x2] sm:$0x3] }
  0x8e   :  { %1273 = vmatprep.subr.bf16.mxu0 %v1272_v4  ;;  %1219 = vmatpush1.bf16.msra.mxu1 %v1218_v5 }
  0x8f   :  { %1293 = vmatprep.subr.bf16.mxu1 %v1292_v31  ;;  %v960_v31 = vld [vmem:[#allocation8 + $0x4b0] sm:$0xff] }
  0x91   :  { %1275 = vmatpush1.bf16.msra.mxu0 %v1274_v8 }
  0x92   :  { %1277 = vmatprep.subr.bf16.mxu0 %v1276_v11  ;;  %v952_v11 = vld [vmem:[#allocation8 + $0x470] sm:$0xff] }
  0x95   :  { %1279 = vmatpush1.bf16.msra.mxu0 %v1278_v14 }
  0x96   :  { %1281 = vmatprep.subr.bf16.mxu0 %v1280_v17  ;;  %v1288_v17 = vpack.c.bf16 %v775_v9, %v773_v6 }
  0x99   :  { %1283 = vmatpush1.bf16.msra.mxu0 %v1282_v20  ;;  %v1306_v20 = vpack.c.bf16 %v952_v11, %v950_v10  ;;  %v986_v10 = vld [vmem:[#allocation8 + $0x580] sm:$0xff]  ;;  %v988_v11 = vld [vmem:[#allocation8 + $0x590] sm:$0xff] }
  0x9a   :  { %1285 = vmatprep.subr.bf16.mxu0 %v1284_v23  ;;  %v956_v23 = vld [vmem:[#allocation8 + $0x490] sm:$0xff]  ;;  %v1342_v12 = vpack.c.bf16 %v988_v11, %v986_v10 }
  0x9d   :  { %1287 = vmatpush1.bf16.msra.mxu0 %v1286_v27  ;;  %v1290_v27 = vpack.c.bf16 %v774_v19, %v772_v18  ;;  %v995_v19 = vld [vmem:[#allocation8 + $0x5c8] sm:$0xff] }
  0x9e   :  { %778 = vmatprep.subr.mxu0 %v777_v28  ;;  %v1310_v28 = vpack.c.bf16 %v956_v23, %v954_v22  ;;  %v994_v22 = vld [vmem:[#allocation8 + $0x5c0] sm:$0xff]  ;;  %v996_v23 = vld [vmem:[#allocation8 + $0x5d0] sm:$0xff] }
  0x9f   :  { %v1350_v24 = vpack.c.bf16 %v996_v23, %v994_v22 }
 0x127   :  { %v236_v39 = vpop.f32.mrb[0].mxu0 }
 0x128   :  { %v253_v40 = vadd.f32 %v246_v37, %v236_v39  ;;  %v238_v41 = vpop.f32.mrb[1].mxu0  ;;  %v1314_v37 = vpack.c.bf16 %v960_v31, %v958_v30  ;;  %v962_v39 = vld [vmem:[#allocation8 + $0x4c0] sm:$0xff]  ;;  %v1000_v30 = vld [vmem:[#allocation8 + $0x5f0] sm:$0xff] }
 0x129   :  { %v254_v44 = vadd.f32 %v250_v38, %v238_v41  ;;  %v1316_v38 = vpack.c.bf16 %v965_v35, %v963_v33  ;;  %v967_v41 = vld [vmem:[#allocation8 + $0x4e8] sm:$0xff]  ;;  %v321_v33 = vld [vmem:[%s1688_s5] sm:$0x3] }
 0x12a   :  { %v255_v49 = vmax.f32 %v253_v40, 0.0  ;;  %v964_v40 = vld [vmem:[#allocation8 + $0x4d0] sm:$0xff]  ;;  %v326_v35 = vrot.slane %v321_v33, %v1606_v34 }
 0x12b   :  { %v256_v47 = vmax.f32 %v254_v44, 0.0  ;;  %v1318_v43 = vpack.c.bf16 %v964_v40, %v962_v39  ;;  %v1320_v44 = vpack.c.bf16 %v969_v42, %v967_v41 }
 0x12d   :  { %397 = vmatprep.mubr.f32.mxu1 %v256_v47  ;;  %v973_v47 = vld [vmem:[#allocation8 + $0x518] sm:$0xff] }
 0x12e   :  { %398 = vmatmul.mubr.f32.vlgmr.msra.gmra.mrb[0].mxu1 %v255_v49  ;;  %v970_v49 = vld [vmem:[#allocation8 + $0x500] sm:$0xff] }
 0x12f   :  { %1295 = vmatpush1.bf16.msra.mxu1 %v1294_v48 }
 0x130   :  { %1297 = vmatprep.subr.bf16.mxu1 %v1296_v50  ;;  %v972_v50 = vld [vmem:[#allocation8 + $0x510] sm:$0xff] }
 0x131   :  { %v1326_v51 = vpack.c.bf16 %v972_v50, %v970_v49 }
 0x133   :  { %v574_v1 = vpop.f32.mrb[2].mxu0  ;;  %1299 = vmatpush1.bf16.msra.mxu1 %v1298_v56  ;;  %v976_v56 = vld [vmem:[#allocation8 + $0x530] sm:$0xff] }
 0x134   :  { %v592_v4 = vadd.f32 %v585_v57, %v574_v1  ;;  %v576_v5 = vpop.f32.mrb[3].mxu0  ;;  %1301 = vmatprep.subr.bf16.mxu1 %v1300_v58  ;;  %v1330_v57 = vpack.c.bf16 %v976_v56, %v974_v55  ;;  %v981_v58 = vld [vmem:[#allocation8 + $0x558] sm:$0xff]  ;;  %v753_v56 = vrot.slane %v1145_v52, %v1606_v34 }
 0x135   :  { %v593_v8 = vadd.f32 %v589_v61, %v576_v5  ;;  %v980_v61 = vld [vmem:[#allocation8 + $0x550] sm:$0xff] }
 0x136   :  { %v594_v15 = vmax.f32 %v592_v4, 0.0  ;;  %v1334_v1 = vpack.c.bf16 %v980_v61, %v978_v59  ;;  %v982_v4 = vld [vmem:[#allocation8 + $0x560] sm:$0xff]  ;;  %v984_v5 = vld [vmem:[#allocation8 + $0x570] sm:$0xff] }
 0x137   :  { %v595_v14 = vmax.f32 %v593_v8, 0.0  ;;  %1303 = vmatpush1.bf16.msra.mxu1 %v1302_v2  ;;  %v1336_v2 = vpack.c.bf16 %v985_v63, %v983_v62  ;;  %v1338_v6 = vpack.c.bf16 %v984_v5, %v982_v4  ;;  %v989_v8 = vld [vmem:[#allocation8 + $0x598] sm:$0xff] }
 0x138   :  { %1305 = vmatprep.subr.bf16.mxu1 %v1304_v7  ;;  %v987_v7 = vld [vmem:[#allocation8 + $0x588] sm:$0xff]  ;;  %v1148_v63 = vld [vmem:[%s1686_s3 + $0x4] sm:$0x3] }
 0x139   :  { %738 = vmatprep.mubr.f32.mxu0 %v595_v14  ;;  %v1340_v9 = vpack.c.bf16 %v989_v8, %v987_v7  ;;  %v993_v14 = vld [vmem:[#allocation8 + $0x5b8] sm:$0xff]  ;;  %v926_v5 = vrot.slane %v1148_v63, %v1606_v34 }
 0x13a   :  { %739 = vmatmul.mubr.f32.vlgmr.msra.gmra.mrb[4].mxu0 %v594_v15  ;;  %v1344_v15 = vpack.c.bf16 %v993_v14, %v991_v13  ;;  %v1149_v13 = vld [vmem:[%s1688_s5 + $0x4] sm:$0x3] }
 0x13b   :  { %779 = vmatpush1.msra.mxu0 %v776_v16  ;;  %842 = vmatprep.mubr.f32.mxu0 %v1494_v0  ;;  %v990_v16 = vld [vmem:[#allocation8 + $0x5a0] sm:$0xff]  ;;  %v1008_v14 = vrot.slane %v1149_v13, %v1606_v34 }
 0x13c   :  { %1289 = vmatprep.subr.bf16.mxu0 %v1288_v17  ;;  %1307 = vmatpush1.bf16.msra.mxu1 %v1306_v20  ;;  %v992_v17 = vld [vmem:[#allocation8 + $0x5b0] sm:$0xff]  ;;  %v997_v20 = vld [vmem:[#allocation8 + $0x5d8] sm:$0xff] }
 0x13d   :  { %1309 = vmatprep.subr.bf16.mxu1 %v1308_v21  ;;  %v1346_v18 = vpack.c.bf16 %v992_v17, %v990_v16  ;;  %v1348_v21 = vpack.c.bf16 %v997_v20, %v995_v19  ;;  %v1150_v16 = vld [vmem:[%s1689_s6 + $0x4] sm:$0x3] }
 0x13e   :  { %1146 = vmatmul.mubr.msk.f32.vlgmr.msra.gmra.mrb[6].mxu0 %vm91_vm0, %v1590_v3  ;;  %v971_v3 = vld [vmem:[#allocation8 + $0x508] sm:$0xff]  ;;  %v1094_v20 = vrot.slane %v1150_v16, %v1606_v34  ;;  %v1098_v22 = vrot.slane %v1150_v16, %v1611_v36 }
 0x13f   :  { %1291 = vmatpush1.bf16.msra.mxu0 %v1290_v27  ;;  %913 = vmatprep.mubr.f32.mxu0 %v1494_v0  ;;  %v1322_v0 = vpack.c.bf16 %v968_v46, %v966_v45  ;;  %v1324_v48 = vpack.c.bf16 %v973_v47, %v971_v3  ;;  %v1001_v27 = vld [vmem:[#allocation8 + $0x5f8] sm:$0xff] }
 0x140   :  { %1311 = vmatpush1.bf16.msra.mxu1 %v1310_v28  ;;  %v1352_v28 = vpack.c.bf16 %v1001_v27, %v999_v25 }
 0x141   :  { %1313 = vmatprep.subr.bf16.mxu1 %v1312_v29  ;;  %v998_v29 = vld [vmem:[#allocation8 + $0x5e0] sm:$0xff] }
 0x142   :  { %v1354_v31 = vpack.c.bf16 %v1000_v30, %v998_v29 }
 0x144   :  { %1315 = vmatpush1.bf16.msra.mxu1 %v1314_v37  ;;  %v330_v37 = vrot.slane %v321_v33, %v1611_v36 }
 0x145   :  { %1317 = vmatprep.subr.bf16.mxu1 %v1316_v38  ;;  %v406_v38 = vld [vmem:[%s1689_s6] sm:$0x3] }
 0x146   :  { %1147 = vmatmul.mubr.msk.f32.vlgmr.msra.gmra.mrb[6].mxu0 %vm166_vm1, %v1595_v26  ;;  %v979_v26 = vld [vmem:[#allocation8 + $0x548] sm:$0xff]  ;;  %v411_v42 = vrot.slane %v406_v38, %v1606_v34 }
 0x147   :  { %v1332_v60 = vpack.c.bf16 %v981_v58, %v979_v26  ;;  %v757_v58 = vrot.slane %v1145_v52, %v1611_v36 }
 0x148   :  { %1319 = vmatpush1.bf16.msra.mxu1 %v1318_v43 }
 0x149   :  { %1321 = vmatprep.subr.bf16.mxu1 %v1320_v44  ;;  %v415_v44 = vrot.slane %v406_v38, %v1611_v36 }
 0x14c   :  { %1323 = vmatpush1.bf16.msra.mxu1 %v1322_v0  ;;  %v1144_v0 = vld [vmem:[%s1688_s5 + $0x2] sm:$0x3] }
 0x14d   :  { %1325 = vmatprep.subr.bf16.mxu1 %v1324_v48  ;;  %v671_v53 = vrot.slane %v1144_v0, %v1611_v36 }
 0x150   :  { %1327 = vmatpush1.bf16.msra.mxu1 %v1326_v51  ;;  %v667_v51 = vrot.slane %v1144_v0, %v1606_v34 }
 0x151   :  { %1329 = vmatprep.subr.bf16.mxu1 %v1328_v54 }
 0x154   :  { %1331 = vmatpush1.bf16.msra.mxu1 %v1330_v57 }
 0x155   :  { %1333 = vmatprep.subr.bf16.mxu1 %v1332_v60 }
 0x158   :  { %1335 = vmatpush1.bf16.msra.mxu1 %v1334_v1 }
 0x159   :  { %1337 = vmatprep.subr.bf16.mxu1 %v1336_v2 }
 0x15c   :  { %1339 = vmatpush1.bf16.msra.mxu1 %v1338_v6  ;;  %v930_v6 = vrot.slane %v1148_v63, %v1611_v36 }
 0x15d   :  { %1341 = vmatprep.subr.bf16.mxu1 %v1340_v9 }
 0x160   :  { %1343 = vmatpush1.bf16.msra.mxu1 %v1342_v12 }
 0x161   :  { %1345 = vmatprep.subr.bf16.mxu1 %v1344_v15  ;;  %v1012_v15 = vrot.slane %v1149_v13, %v1611_v36  ;;  %v1151_v36 = vld [vmem:[%s1690_s7] ss:$0 sm:$0xff] }
 0x164   :  { %1347 = vmatpush1.bf16.msra.mxu1 %v1346_v18 }
 0x165   :  { %1349 = vmatprep.subr.bf16.mxu1 %v1348_v21 }
 0x168   :  { %1351 = vmatpush1.bf16.msra.mxu1 %v1350_v24 }
 0x169   :  { %1353 = vmatprep.subr.bf16.mxu1 %v1352_v28 }
 0x16c   :  { %1355 = vmatpush1.bf16.msra.mxu1 %v1354_v31  ;;  %v84_v31 = vand.u32 127, %v83_v32 }
 0x16e   :  { %vm426_vm3 = vcmp.eq.s32.totalorder %v84_v31, 0  ;;  %vm767_vm4 = vcmp.eq.s32.totalorder %v84_v31, 1  ;;  %vm1108_vm5 = vcmp.eq.s32.totalorder %v84_v31, 2 }
 0x201   :  { %v399_v39 = vpop.f32.mrb[0].mxu1 }
 0x202   :  { %v400_v40 = vadd.f32 %v399_v39, %v326_v35  ;;  %v401_v41 = vpop.f32.mrb[1].mxu1 }
 0x203   :  { %v402_v43 = vadd.f32 %v401_v41, %v330_v37 }
 0x204   :  { %v404_v45 = vmax.f32 %v400_v40, 0.0 }
 0x205   :  { %v405_v46 = vmax.f32 %v402_v43, 0.0 }
 0x206   :  { %v418_v3 = vmul.f32 %v411_v42, %v404_v45 }
 0x207   :  { %v419_v47 = vmul.f32 %v415_v44, %v405_v46 }
 0x208   :  { %v421_v48 = vsel %vm420_vm2, %v418_v3, 0.0 }
 0x209   :  { %v422_v49 = vsel %vm420_vm2, %v419_v47, 0.0 }
 0x20a   :  { %v423_v50 = vadd.f32 %v422_v49, %v421_v48 }
 0x20c   :  { %424 = vadd.xlane.f32.xlu0 %v423_v50 }
 0x20d   :  { %v740_v54 = vpop.f32.mrb[4].mxu0 }
 0x20e   :  { %v741_v55 = vadd.f32 %v740_v54, %v667_v51  ;;  %v742_v57 = vpop.f32.mrb[5].mxu0 }
 0x20f   :  { %v743_v26 = vadd.f32 %v742_v57, %v671_v53 }
 0x210   :  { %v745_v59 = vmax.f32 %v741_v55, 0.0 }
 0x211   :  { %v746_v60 = vmax.f32 %v743_v26, 0.0 }
 0x212   :  { %v760_v61 = vmul.f32 %v753_v56, %v745_v59 }
 0x213   :  { %v761_v62 = vmul.f32 %v757_v58, %v746_v60 }
 0x214   :  { %v762_v1 = vsel %vm420_vm2, %v760_v61, 0.0 }
 0x215   :  { %v763_v2 = vsel %vm420_vm2, %v761_v62, 0.0 }
 0x216   :  { %v764_v4 = vadd.f32 %v763_v2, %v762_v1 }
 0x218   :  { %765 = vadd.xlane.f32.xlu0 %v764_v4 }
 0x219   :  { %v915_v7 = vpop.f32.mrb[6].mxu0 }
 0x21a   :  { %v933_v8 = vadd.f32 %v926_v5, %v915_v7  ;;  %v917_v9 = vpop.f32.mrb[7].mxu0 }
 0x21b   :  { %v934_v10 = vadd.f32 %v930_v6, %v917_v9 }
 0x21c   :  { %v935_v12 = vmax.f32 %v933_v8, 0.0 }
 0x21d   :  { %v936_v11 = vmax.f32 %v934_v10, 0.0 }
 0x21f   :  { %1079 = vmatprep.mubr.f32.mxu1 %v936_v11 }
 0x220   :  { %1080 = vmatmul.mubr.f32.vlgmr.msra.gmra.mrb[2].mxu1 %v935_v12 }
 0x299   :  { %v425_v33 = vpop.xlane.xlu0 %424 }
 0x29a   :  { %v429_v34 = vsel %vm426_vm3, %v425_v33, 0.0 }
 0x2a5   :  { %v766_v35 = vpop.xlane.xlu0 %765 }
 0x2a6   :  { %v770_v37 = vsel %vm767_vm4, %v766_v35, %v429_v34 }
 0x2f3   :  { %v1081_v17 = vpop.f32.mrb[2].mxu1 }
 0x2f4   :  { %v1082_v18 = vadd.f32 %v1081_v17, %v1008_v14  ;;  %v1083_v19 = vpop.f32.mrb[3].mxu1 }
 0x2f5   :  { %v1084_v21 = vadd.f32 %v1083_v19, %v1012_v15 }
 0x2f6   :  { %v1086_v23 = vmax.f32 %v1082_v18, 0.0 }
 0x2f7   :  { %v1087_v24 = vmax.f32 %v1084_v21, 0.0 }
 0x2f8   :  { %v1101_v25 = vmul.f32 %v1094_v20, %v1086_v23 }
 0x2f9   :  { %v1102_v27 = vmul.f32 %v1098_v22, %v1087_v24 }
 0x2fa   :  { %v1103_v28 = vsel %vm420_vm2, %v1101_v25, 0.0 }
 0x2fb   :  { %v1104_v29 = vsel %vm420_vm2, %v1102_v27, 0.0 }
 0x2fc   :  { %v1105_v30 = vadd.f32 %v1104_v29, %v1103_v28 }
 0x2fe   :  { %1106 = vadd.xlane.f32.xlu1 %v1105_v30 }
 0x38b   :  { %v1107_v38 = vpop.xlane.xlu1 %1106 }
 0x38c   :  { %v1111_v39 = vsel %vm1108_vm5, %v1107_v38, %v770_v37 }
 0x38d   :  { %v1119_v40 = vadd.f32 %v1151_v36, %v1111_v39 }
 0x38f   :  { %1121 = vst.msk [vmem:[#allocation10] sm:$0x3] %vm1120_vm6, %v1119_v40 }
 0x390   :  { %1469 = shalt.err (!%p1466_p8)
}
 0x391   :  { %s1470_s7 = scalar_lea.hbm %s1691_s8, 32 }
 0x392   :  { %p1471_p9 = scmp.ne.s32.totalorder %s1691_s8, %s1470_s7  ;;  %p1474_p10 = scmp.lt.u32.totalorder %s1470_s7, %s1691_s8 }
 0x394   :  { %p1476_p11 = pnand %p1474_p10, %p1471_p9 }
 0x396   :  { %1479 = shalt.err (!%p1476_p11)
}
 0x397   :  { %1131 = dma.vmem_to_hbm [thread:$0]  %s1129_s23, 32, %s1691_s8, [#allocation4]  }
 0x398   :  { %1486 = dma.done.wait [#allocation4], 32  }
 0x399   :  { %1487 = vsyncadd [#allocation4], 4294967264 }
 0x39a   :  { %1135 = vsyncpa [#allocation3], 1 }
 0x39b   :  { %1136 = vsyncpa [#allocation6], 1 }
 0x39c   :  { %1137 = vsyncpa [#allocation9], 1 }
 0x39d   :  { %1138 = vsyncpa [#allocation4], 1 }

</bundles_post_ra>
